<compile_context>
chip_gen: v7x
topology: tpu7x:2x2x1
jax: 0.10.0
libtpu: 0.0.40
codegen_flags: <defaults>
</compile_context>

<pallas_src>
import jax
import jax.numpy as jnp
from jax.experimental import pallas as pl
from jax.experimental.pallas import tpu as pltpu

LN_EPS = 1e-5        # PyTorch LayerNorm default
NEG_INF = -1e30      # additive key-padding bias


def _layer_norm(h, g, b):
    mu = jnp.mean(h, axis=-1, keepdims=True)
    var = jnp.mean(jnp.square(h - mu), axis=-1, keepdims=True)
    return (h - mu) * jax.lax.rsqrt(var + LN_EPS) * g + b


def _encoder_layer_kernel(x_ref, kbias_ref, qmask_ref,
                          wq_ref, bq_ref, wkv_ref, bkv_ref,
                          wo_ref, bo_ref, g1_ref, be1_ref,
                          w1_ref, bf1_ref, w2_ref, bf2_ref,
                          g2_ref, be2_ref,
                          o_ref):
    Bb, S, D = x_ref.shape
    K = o_ref.shape[1]
    md = wq_ref.dtype            # matmul operand dtype (weights pre-cast on host)

    x = x_ref[...].astype(jnp.float32)           # (Bb, S, D)
    xq = x[:, S - K:, :]                          # (Bb, K, D)  query rows only

    # ---- projections: K/V over all S rows, Q over the last K rows only ----
    kv = jnp.dot(x.reshape(Bb * S, D).astype(md), wkv_ref[...],
                 preferred_element_type=jnp.float32) + bkv_ref[...]
    kv = kv.reshape(Bb, S, 2 * D)
    k = kv[..., :D]
    v = kv[..., D:]

    q = jnp.dot(xq.reshape(Bb * K, D).astype(md), wq_ref[...],
                preferred_element_type=jnp.float32) + bq_ref[...]
    q = q.reshape(Bb, K, D)

    # ---- single-head scaled dot-product attention (batched over Bb) ----
    scale = jnp.float32(1.0) / jnp.sqrt(jnp.float32(D))
    scores = jnp.einsum("bqd,bkd->bqk", q.astype(md), k.astype(md),
                        preferred_element_type=jnp.float32) * scale      # (Bb,K,S)
    scores = scores + kbias_ref[...]              # additive key-padding bias, f32
    smax = jnp.max(scores, axis=-1, keepdims=True)
    e = jnp.exp(scores - smax)
    p = e * pl.reciprocal(jnp.sum(e, axis=-1, keepdims=True), approx=True)
    sa = jnp.einsum("bqk,bkd->bqd", p.astype(md), v.astype(md),
                    preferred_element_type=jnp.float32)                  # (Bb,K,D)

    # ---- output projection + residual + LayerNorm 1 (last K rows only) ----
    h1 = (xq.reshape(Bb * K, D)
          + jnp.dot(sa.reshape(Bb * K, D).astype(md), wo_ref[...],
                    preferred_element_type=jnp.float32) + bo_ref[...])
    x1 = _layer_norm(h1, g1_ref[...], be1_ref[...])

    # ---- feed forward: linear2(relu(linear1(x1))) ----
    ff = jnp.dot(x1.astype(md), w1_ref[...],
                 preferred_element_type=jnp.float32) + bf1_ref[...]
    ff = jnp.maximum(ff, 0.0)
    ff = jnp.dot(ff.astype(md), w2_ref[...],
                 preferred_element_type=jnp.float32) + bf2_ref[...]

    # ---- residual + LayerNorm 2 ----
    x2 = _layer_norm(x1 + ff, g2_ref[...], be2_ref[...])                 # (Bb*K, D)

    # ---- final masked_fill (as in the PyTorch reference): keep PADDED rows,
    #      zero non-padded rows.  qmask (Bb,K,1) is host-prepared (1.0 = padded).
    out = x2.reshape(Bb, K, D) * qmask_ref[...]
    o_ref[...] = out.astype(o_ref.dtype)


def init_params(key, d_model, d_ff):
    """Deterministic synthetic parameters, stored pre-transposed as (in, out).

    For real nn.MultiheadAttention weights: wq = in_proj_weight[:D].T,
    wkv = in_proj_weight[D:].T, bq/bkv the matching slices of in_proj_bias.
    """
    ks = jax.random.split(key, 5)
    s = 0.05

    def rnd(k, shape):
        return s * jax.random.normal(k, shape, jnp.float32)

    return dict(
        wq=rnd(ks[0], (d_model, d_model)),
        bq=jnp.zeros((1, d_model), jnp.float32),
        wkv=rnd(ks[1], (d_model, 2 * d_model)),
        bkv=jnp.zeros((1, 2 * d_model), jnp.float32),
        wo=rnd(ks[2], (d_model, d_model)),
        bo=0.01 * jnp.ones((1, d_model), jnp.float32),
        g1=jnp.ones((1, d_model), jnp.float32),
        be1=jnp.zeros((1, d_model), jnp.float32),
        w1=rnd(ks[3], (d_model, d_ff)),
        bf1=0.01 * jnp.ones((1, d_ff), jnp.float32),
        w2=rnd(ks[4], (d_ff, d_model)),
        bf2=0.01 * jnp.ones((1, d_model), jnp.float32),
        g2=jnp.ones((1, d_model), jnp.float32),
        be2=jnp.zeros((1, d_model), jnp.float32),
    )


def _adjust_mask(mask):
    """adjust_mask: if a row is fully padded, un-pad its last position."""
    kpm = mask.astype(jnp.bool_)
    fully_masked = jnp.all(kpm, axis=-1)
    return kpm.at[:, -1].set(jnp.where(fully_masked, False, kpm[:, -1]))


def _param_spec(arr):
    """Full-block, constant-index weight spec; single-buffered (no rotation)."""
    idx = lambda g: (0,) * arr.ndim
    try:
        return pl.BlockSpec(arr.shape, idx, pipeline_mode=pl.Buffered(1))
    except TypeError:  # older BlockSpec signature without pipeline_mode
        return pl.BlockSpec(arr.shape, idx)


_PARAM_NAMES = ("wq", "bq", "wkv", "bkv", "wo", "bo", "g1", "be1",
                "w1", "bf1", "w2", "bf2", "g2", "be2")
_MATMUL_WEIGHTS = frozenset(("wq", "wkv", "wo", "w1", "w2"))


def self_attention_transformer_fwd(params, sequence_emb, mask, first_k_cols,
                                   *, batch_grid=None,
                                   matmul_dtype=jnp.float32):
    """Equivalent of SelfAttentionTransformer.forward(sequence_emb, mask).

    batch_grid=None : one batch element per grid step (default; gives DMA/compute
                      overlap and a v7x megacore split).
    batch_grid=1    : whole batch in a single step (only for tiny problems).
    matmul_dtype    : bf16 feeds the MXU bf16 operands (valid on v5e/v6e/v7x);
                      softmax / LayerNorm math always stays f32.
    """
    B, S, D = sequence_emb.shape
    K = first_k_cols
    assert K <= S
    if batch_grid is None:
        batch_grid = B
    assert B % batch_grid == 0
    Bb = B // batch_grid
    FF = params["w1"].shape[1]

    kpm = _adjust_mask(mask)                                   # (B, S) bool, True == padded
    # Host-prepared mask inputs (no in-kernel transpose gymnastics):
    kbias = kpm.astype(jnp.float32).reshape(B, 1, S) * jnp.float32(NEG_INF)
    qmask = kpm[:, S - K:].astype(jnp.float32).reshape(B, K, 1)  # 1.0 = padded = KEEP

    # Weights pre-cast on host (bf16 halves weight DMA/VMEM); biases/LN stay f32.
    param_vals = [params[n].astype(matmul_dtype) if n in _MATMUL_WEIGHTS
                  else params[n].astype(jnp.float32) for n in _PARAM_NAMES]

    # VMEM budget: single-buffered weights + double-buffered activation blocks
    # + f32 intermediates (with headroom), kept under the v7x 64 MiB ceiling.
    weight_bytes = sum(int(p.size) * p.dtype.itemsize for p in param_vals)
    act_block = (Bb * S * D + Bb * S + Bb * K + Bb * K * D) * 4
    inter = (Bb * S * 2 * D + 2 * Bb * K * S + 5 * Bb * K * D + Bb * K * FF) * 4
    vmem_limit = int(min(max(weight_bytes + 2 * act_block + 2 * inter + (4 << 20),
                             16 << 20), 64 << 20))

    out = pl.pallas_call(
        _encoder_layer_kernel,
        out_shape=jax.ShapeDtypeStruct((B, K, D), sequence_emb.dtype),
        grid_spec=pltpu.PrefetchScalarGridSpec(
            num_scalar_prefetch=0,
            grid=(batch_grid,),
            in_specs=[pl.BlockSpec((Bb, S, D), lambda g: (g, 0, 0)),
                      pl.BlockSpec((Bb, 1, S), lambda g: (g, 0, 0)),
                      pl.BlockSpec((Bb, K, 1), lambda g: (g, 0, 0))]
                     + [_param_spec(p) for p in param_vals],
            out_specs=pl.BlockSpec((Bb, K, D), lambda g: (g, 0, 0)),
        ),
        compiler_params=pltpu.CompilerParams(
            dimension_semantics=("parallel",),
            vmem_limit_bytes=vmem_limit),
    )(sequence_emb, kbias, qmask, *param_vals)

    return out, kpm[:, -K:]


def reference_fwd(params, sequence_emb, mask, first_k_cols):
    """Pure-JAX reference (computes all S rows, then slices)."""
    B, S, D = sequence_emb.shape
    kpm = _adjust_mask(mask)
    x = sequence_emb.astype(jnp.float32)

    q = x @ params["wq"] + params["bq"]
    kv = x @ params["wkv"] + params["bkv"]
    k, v = kv[..., :D], kv[..., D:]
    scores = jnp.einsum("bqd,bkd->bqk", q, k) / jnp.sqrt(jnp.float32(D))
    scores = jnp.where(kpm[:, None, :], NEG_INF, scores)
    attn = jax.nn.softmax(scores, axis=-1)
    sa = jnp.einsum("bqk,bkd->bqd", attn, v) @ params["wo"] + params["bo"]

    x1 = _layer_norm(x + sa, params["g1"], params["be1"])
    ff = jnp.maximum(x1 @ params["w1"] + params["bf1"], 0.0) @ params["w2"] + params["bf2"]
    x2 = _layer_norm(x1 + ff, params["g2"], params["be2"])

    # masked_fill((key_padding_mask == 0).unsqueeze(-1), 0.0): zero NON-padded rows.
    out = jnp.where(kpm[:, :, None], x2, 0.0)
    return out[:, -first_k_cols:], kpm[:, -first_k_cols:]


if __name__ == "__main__":
    B, S, D, FF = 2, 16, 32, 64
    first_k_cols = 8

    key = jax.random.PRNGKey(0)
    kx, kp = jax.random.split(key)

    sequence_emb = jax.random.normal(kx, (B, S, D), jnp.float32)
    # mask: 1 == padded.  Row 0 pads its first 4 positions; row 1 is fully
    # padded, which exercises adjust_mask (it un-pads the last position).
    mask = jnp.concatenate(
        [jnp.concatenate([jnp.ones((1, 4)), jnp.zeros((1, S - 4))], axis=1),
         jnp.ones((1, S))], axis=0).astype(jnp.int32)

    params = init_params(kp, D, FF)

    ref_out, ref_kpm = reference_fwd(params, sequence_emb, mask, first_k_cols)

    # Default: one batch element per grid step, f32 matmuls.
    out, kpm_out = self_attention_transformer_fwd(
        params, sequence_emb, mask, first_k_cols)
    jax.block_until_ready(out)
    assert out.shape == (B, first_k_cols, D)
    assert kpm_out.shape == (B, first_k_cols)
    assert jnp.isfinite(out).all()
    assert bool(jnp.array_equal(kpm_out, ref_kpm))
    err = float(jnp.max(jnp.abs(out - ref_out)))
    assert err < 5e-2, f"kernel/reference mismatch: max abs err {err}"

    # Single-step grid variant (whole batch at once) must agree.
    out1, _ = self_attention_transformer_fwd(
        params, sequence_emb, mask, first_k_cols, batch_grid=1)
    jax.block_until_ready(out1)
    assert float(jnp.max(jnp.abs(out1 - out))) < 1e-3

    # bf16 MXU-operand variant (weights pre-cast on host); softmax/LN stay f32.
    out3, _ = self_attention_transformer_fwd(
        params, sequence_emb, mask, first_k_cols, matmul_dtype=jnp.bfloat16)
    jax.block_until_ready(out3)
    assert jnp.isfinite(out3).all()
    assert float(jnp.max(jnp.abs(out3 - ref_out))) < 2.5e-1

    print("KERNEL_OK")
</pallas_src>

<mosaic_0001>
module attributes {stable_mosaic.version = 11 : i64} {
  func.func @_encoder_layer_kernel(%arg0: i32, %arg1: memref<1x16x32xf32, #tpu.memory_space<vmem>>, %arg2: memref<1x1x16xf32, #tpu.memory_space<vmem>>, %arg3: memref<1x8x1xf32, #tpu.memory_space<vmem>>, %arg4: memref<32x32xf32, #tpu.memory_space<vmem>>, %arg5: memref<1x32xf32, #tpu.memory_space<vmem>>, %arg6: memref<32x64xf32, #tpu.memory_space<vmem>>, %arg7: memref<1x64xf32, #tpu.memory_space<vmem>>, %arg8: memref<32x32xf32, #tpu.memory_space<vmem>>, %arg9: memref<1x32xf32, #tpu.memory_space<vmem>>, %arg10: memref<1x32xf32, #tpu.memory_space<vmem>>, %arg11: memref<1x32xf32, #tpu.memory_space<vmem>>, %arg12: memref<32x64xf32, #tpu.memory_space<vmem>>, %arg13: memref<1x64xf32, #tpu.memory_space<vmem>>, %arg14: memref<64x32xf32, #tpu.memory_space<vmem>>, %arg15: memref<1x32xf32, #tpu.memory_space<vmem>>, %arg16: memref<1x32xf32, #tpu.memory_space<vmem>>, %arg17: memref<1x32xf32, #tpu.memory_space<vmem>>, %arg18: memref<1x8x32xf32, #tpu.memory_space<vmem>>) attributes {dimension_semantics = [#tpu.dimension_semantics<parallel>], iteration_bounds = array<i64: 2>, scalar_prefetch = 0 : i64, scratch_operands = 0 : i64, tpu.core_type = #tpu.core_type<tc>, window_params = [{transform_indices = @transform_0, window_bounds = array<i64: 1, 16, 32>}, {transform_indices = @transform_1, window_bounds = array<i64: 1, 1, 16>}, {transform_indices = @transform_2, window_bounds = array<i64: 1, 8, 1>}, {pipeline_mode = #tpu.pipeline_mode<synchronous>, transform_indices = @transform_3, window_bounds = array<i64: 32, 32>}, {pipeline_mode = #tpu.pipeline_mode<synchronous>, transform_indices = @transform_4, window_bounds = array<i64: 1, 32>}, {pipeline_mode = #tpu.pipeline_mode<synchronous>, transform_indices = @transform_5, window_bounds = array<i64: 32, 64>}, {pipeline_mode = #tpu.pipeline_mode<synchronous>, transform_indices = @transform_6, window_bounds = array<i64: 1, 64>}, {pipeline_mode = #tpu.pipeline_mode<synchronous>, transform_indices = @transform_7, window_bounds = array<i64: 32, 32>}, {pipeline_mode = #tpu.pipeline_mode<synchronous>, transform_indices = @transform_8, window_bounds = array<i64: 1, 32>}, {pipeline_mode = #tpu.pipeline_mode<synchronous>, transform_indices = @transform_9, window_bounds = array<i64: 1, 32>}, {pipeline_mode = #tpu.pipeline_mode<synchronous>, transform_indices = @transform_10, window_bounds = array<i64: 1, 32>}, {pipeline_mode = #tpu.pipeline_mode<synchronous>, transform_indices = @transform_11, window_bounds = array<i64: 32, 64>}, {pipeline_mode = #tpu.pipeline_mode<synchronous>, transform_indices = @transform_12, window_bounds = array<i64: 1, 64>}, {pipeline_mode = #tpu.pipeline_mode<synchronous>, transform_indices = @transform_13, window_bounds = array<i64: 64, 32>}, {pipeline_mode = #tpu.pipeline_mode<synchronous>, transform_indices = @transform_14, window_bounds = array<i64: 1, 32>}, {pipeline_mode = #tpu.pipeline_mode<synchronous>, transform_indices = @transform_15, window_bounds = array<i64: 1, 32>}, {pipeline_mode = #tpu.pipeline_mode<synchronous>, transform_indices = @transform_16, window_bounds = array<i64: 1, 32>}, {transform_indices = @transform_17, window_bounds = array<i64: 1, 8, 32>}]} {
    %c0 = arith.constant 0 : index
    %c0_0 = arith.constant 0 : index
    %c0_1 = arith.constant 0 : index
    %0 = vector.load %arg1[%c0, %c0_0, %c0_1] : memref<1x16x32xf32, #tpu.memory_space<vmem>>, vector<1x16x32xf32>
    %1 = vector.extract_strided_slice %0 {offsets = [0, 8, 0], sizes = [1, 8, 32], strides = [1, 1, 1]} : vector<1x16x32xf32> to vector<1x8x32xf32>
    %2 = vector.shape_cast %0 : vector<1x16x32xf32> to vector<16x32xf32>
    %c0_2 = arith.constant 0 : index
    %c0_3 = arith.constant 0 : index
    %3 = vector.load %arg6[%c0_2, %c0_3] : memref<32x64xf32, #tpu.memory_space<vmem>>, vector<32x64xf32>
    %cst = arith.constant dense<0.000000e+00> : vector<16x64xf32>
    %4 = tpu.matmul %2, %3, %cst {dimension_numbers = #tpu.dot_dimension_numbers<[1], [0], [0], [1], [0, 0, 1, 1], [], []>} : vector<16x32xf32>, vector<32x64xf32>, vector<16x64xf32> -> vector<16x64xf32>
    %c0_4 = arith.constant 0 : index
    %c0_5 = arith.constant 0 : index
    %5 = vector.load %arg7[%c0_4, %c0_5] : memref<1x64xf32, #tpu.memory_space<vmem>>, vector<1x64xf32>
    %6 = vector.broadcast %5 : vector<1x64xf32> to vector<16x64xf32>
    %7 = arith.addf %4, %6 : vector<16x64xf32>
    %8 = vector.shape_cast %7 : vector<16x64xf32> to vector<1x16x64xf32>
    %9 = vector.extract_strided_slice %8 {offsets = [0, 0, 0], sizes = [1, 16, 32], strides = [1, 1, 1]} : vector<1x16x64xf32> to vector<1x16x32xf32>
    %10 = vector.extract_strided_slice %8 {offsets = [0, 0, 32], sizes = [1, 16, 32], strides = [1, 1, 1]} : vector<1x16x64xf32> to vector<1x16x32xf32>
    %11 = vector.shape_cast %1 : vector<1x8x32xf32> to vector<8x32xf32>
    %c0_6 = arith.constant 0 : index
    %c0_7 = arith.constant 0 : index
    %12 = vector.load %arg4[%c0_6, %c0_7] : memref<32x32xf32, #tpu.memory_space<vmem>>, vector<32x32xf32>
    %cst_8 = arith.constant dense<0.000000e+00> : vector<8x32xf32>
    %13 = tpu.matmul %11, %12, %cst_8 {dimension_numbers = #tpu.dot_dimension_numbers<[1], [0], [0], [1], [0, 0, 1, 1], [], []>} : vector<8x32xf32>, vector<32x32xf32>, vector<8x32xf32> -> vector<8x32xf32>
    %c0_9 = arith.constant 0 : index
    %c0_10 = arith.constant 0 : index
    %14 = vector.load %arg5[%c0_9, %c0_10] : memref<1x32xf32, #tpu.memory_space<vmem>>, vector<1x32xf32>
    %15 = vector.broadcast %14 : vector<1x32xf32> to vector<8x32xf32>
    %16 = arith.addf %13, %15 : vector<8x32xf32>
    %17 = vector.shape_cast %16 : vector<8x32xf32> to vector<1x8x32xf32>
    %cst_11 = arith.constant 3.200000e+01 : f32
    %18 = math.sqrt %cst_11 : f32
    %cst_12 = arith.constant 1.000000e+00 : f32
    %19 = arith.divf %cst_12, %18 : f32
    "tpu.trace_start"() <{level = 10 : i32, message = "bqd,bkd->bqk"}> : () -> ()
    %cst_13 = arith.constant dense<0.000000e+00> : vector<1x8x16xf32>
    %20 = tpu.matmul %17, %9, %cst_13 {dimension_numbers = #tpu.dot_dimension_numbers<[2], [2], [1], [1], [0, 0, 0, 1, 1, 1], [0], [0]>} : vector<1x8x32xf32>, vector<1x16x32xf32>, vector<1x8x16xf32> -> vector<1x8x16xf32>
    "tpu.trace_stop"() : () -> ()
    %21 = vector.broadcast %19 : f32 to vector<1x8x16xf32>
    %22 = arith.mulf %20, %21 : vector<1x8x16xf32>
    %c0_14 = arith.constant 0 : index
    %c0_15 = arith.constant 0 : index
    %c0_16 = arith.constant 0 : index
    %23 = vector.load %arg2[%c0_14, %c0_15, %c0_16] : memref<1x1x16xf32, #tpu.memory_space<vmem>>, vector<1x1x16xf32>
    %24 = vector.broadcast %23 : vector<1x1x16xf32> to vector<1x8x16xf32>
    %25 = arith.addf %22, %24 : vector<1x8x16xf32>
    %cst_17 = arith.constant dense<0xFF800000> : vector<1x8xf32>
    %26 = vector.multi_reduction <maximumf>, %25, %cst_17 [2] : vector<1x8x16xf32> to vector<1x8xf32>
    %27 = vector.shape_cast %26 : vector<1x8xf32> to vector<1x8x1xf32>
    %28 = vector.broadcast %27 : vector<1x8x1xf32> to vector<1x8x16xf32>
    %29 = arith.subf %25, %28 : vector<1x8x16xf32>
    %30 = math.exp %29 : vector<1x8x16xf32>
    %cst_18 = arith.constant dense<0.000000e+00> : vector<1x8xf32>
    %31 = vector.multi_reduction <add>, %30, %cst_18 [2] : vector<1x8x16xf32> to vector<1x8xf32>
    %32 = vector.shape_cast %31 : vector<1x8xf32> to vector<1x8x1xf32>
    %33 = tpu.reciprocal %32 {approx = true} : vector<1x8x1xf32> -> vector<1x8x1xf32>
    %34 = vector.broadcast %33 : vector<1x8x1xf32> to vector<1x8x16xf32>
    %35 = arith.mulf %30, %34 : vector<1x8x16xf32>
    "tpu.trace_start"() <{level = 10 : i32, message = "bqk,bkd->bqd"}> : () -> ()
    %cst_19 = arith.constant dense<0.000000e+00> : vector<1x8x32xf32>
    %36 = tpu.matmul %35, %10, %cst_19 {dimension_numbers = #tpu.dot_dimension_numbers<[2], [1], [1], [2], [0, 0, 0, 1, 1, 2], [0], [0]>} : vector<1x8x16xf32>, vector<1x16x32xf32>, vector<1x8x32xf32> -> vector<1x8x32xf32>
    "tpu.trace_stop"() : () -> ()
    %37 = vector.shape_cast %1 : vector<1x8x32xf32> to vector<8x32xf32>
    %38 = vector.shape_cast %36 : vector<1x8x32xf32> to vector<8x32xf32>
    %c0_20 = arith.constant 0 : index
    %c0_21 = arith.constant 0 : index
    %39 = vector.load %arg8[%c0_20, %c0_21] : memref<32x32xf32, #tpu.memory_space<vmem>>, vector<32x32xf32>
    %cst_22 = arith.constant dense<0.000000e+00> : vector<8x32xf32>
    %40 = tpu.matmul %38, %39, %cst_22 {dimension_numbers = #tpu.dot_dimension_numbers<[1], [0], [0], [1], [0, 0, 1, 1], [], []>} : vector<8x32xf32>, vector<32x32xf32>, vector<8x32xf32> -> vector<8x32xf32>
    %41 = arith.addf %37, %40 : vector<8x32xf32>
    %c0_23 = arith.constant 0 : index
    %c0_24 = arith.constant 0 : index
    %42 = vector.load %arg9[%c0_23, %c0_24] : memref<1x32xf32, #tpu.memory_space<vmem>>, vector<1x32xf32>
    %43 = vector.broadcast %42 : vector<1x32xf32> to vector<8x32xf32>
    %44 = arith.addf %41, %43 : vector<8x32xf32>
    %c0_25 = arith.constant 0 : index
    %c0_26 = arith.constant 0 : index
    %45 = vector.load %arg10[%c0_25, %c0_26] : memref<1x32xf32, #tpu.memory_space<vmem>>, vector<1x32xf32>
    %c0_27 = arith.constant 0 : index
    %c0_28 = arith.constant 0 : index
    %46 = vector.load %arg11[%c0_27, %c0_28] : memref<1x32xf32, #tpu.memory_space<vmem>>, vector<1x32xf32>
    %cst_29 = arith.constant dense<0.000000e+00> : vector<8xf32>
    %47 = vector.multi_reduction <add>, %44, %cst_29 [1] : vector<8x32xf32> to vector<8xf32>
    %48 = vector.shape_cast %47 : vector<8xf32> to vector<8x1xf32>
    %cst_30 = arith.constant 3.200000e+01 : f32
    %49 = vector.broadcast %cst_30 : f32 to vector<8x1xf32>
    %50 = arith.divf %48, %49 : vector<8x1xf32>
    %51 = vector.broadcast %50 : vector<8x1xf32> to vector<8x32xf32>
    %52 = arith.subf %44, %51 : vector<8x32xf32>
    %53 = arith.mulf %52, %52 : vector<8x32xf32>
    %cst_31 = arith.constant dense<0.000000e+00> : vector<8xf32>
    %54 = vector.multi_reduction <add>, %53, %cst_31 [1] : vector<8x32xf32> to vector<8xf32>
    %55 = vector.shape_cast %54 : vector<8xf32> to vector<8x1xf32>
    %cst_32 = arith.constant 3.200000e+01 : f32
    %56 = vector.broadcast %cst_32 : f32 to vector<8x1xf32>
    %57 = arith.divf %55, %56 : vector<8x1xf32>
    %58 = vector.broadcast %50 : vector<8x1xf32> to vector<8x32xf32>
    %59 = arith.subf %44, %58 : vector<8x32xf32>
    %cst_33 = arith.constant 9.99999974E-6 : f32
    %60 = vector.broadcast %cst_33 : f32 to vector<8x1xf32>
    %61 = arith.addf %57, %60 : vector<8x1xf32>
    %62 = math.rsqrt %61 : vector<8x1xf32>
    %63 = vector.broadcast %62 : vector<8x1xf32> to vector<8x32xf32>
    %64 = arith.mulf %59, %63 : vector<8x32xf32>
    %65 = vector.broadcast %45 : vector<1x32xf32> to vector<8x32xf32>
    %66 = arith.mulf %64, %65 : vector<8x32xf32>
    %67 = vector.broadcast %46 : vector<1x32xf32> to vector<8x32xf32>
    %68 = arith.addf %66, %67 : vector<8x32xf32>
    %c0_34 = arith.constant 0 : index
    %c0_35 = arith.constant 0 : index
    %69 = vector.load %arg12[%c0_34, %c0_35] : memref<32x64xf32, #tpu.memory_space<vmem>>, vector<32x64xf32>
    %cst_36 = arith.constant dense<0.000000e+00> : vector<8x64xf32>
    %70 = tpu.matmul %68, %69, %cst_36 {dimension_numbers = #tpu.dot_dimension_numbers<[1], [0], [0], [1], [0, 0, 1, 1], [], []>} : vector<8x32xf32>, vector<32x64xf32>, vector<8x64xf32> -> vector<8x64xf32>
    %c0_37 = arith.constant 0 : index
    %c0_38 = arith.constant 0 : index
    %71 = vector.load %arg13[%c0_37, %c0_38] : memref<1x64xf32, #tpu.memory_space<vmem>>, vector<1x64xf32>
    %72 = vector.broadcast %71 : vector<1x64xf32> to vector<8x64xf32>
    %73 = arith.addf %70, %72 : vector<8x64xf32>
    %cst_39 = arith.constant 0.000000e+00 : f32
    %74 = vector.broadcast %cst_39 : f32 to vector<8x64xf32>
    %75 = arith.maximumf %73, %74 : vector<8x64xf32>
    %c0_40 = arith.constant 0 : index
    %c0_41 = arith.constant 0 : index
    %76 = vector.load %arg14[%c0_40, %c0_41] : memref<64x32xf32, #tpu.memory_space<vmem>>, vector<64x32xf32>
    %cst_42 = arith.constant dense<0.000000e+00> : vector<8x32xf32>
    %77 = tpu.matmul %75, %76, %cst_42 {dimension_numbers = #tpu.dot_dimension_numbers<[1], [0], [0], [1], [0, 0, 1, 1], [], []>} : vector<8x64xf32>, vector<64x32xf32>, vector<8x32xf32> -> vector<8x32xf32>
    %c0_43 = arith.constant 0 : index
    %c0_44 = arith.constant 0 : index
    %78 = vector.load %arg15[%c0_43, %c0_44] : memref<1x32xf32, #tpu.memory_space<vmem>>, vector<1x32xf32>
    %79 = vector.broadcast %78 : vector<1x32xf32> to vector<8x32xf32>
    %80 = arith.addf %77, %79 : vector<8x32xf32>
    %81 = arith.addf %68, %80 : vector<8x32xf32>
    %c0_45 = arith.constant 0 : index
    %c0_46 = arith.constant 0 : index
    %82 = vector.load %arg16[%c0_45, %c0_46] : memref<1x32xf32, #tpu.memory_space<vmem>>, vector<1x32xf32>
    %c0_47 = arith.constant 0 : index
    %c0_48 = arith.constant 0 : index
    %83 = vector.load %arg17[%c0_47, %c0_48] : memref<1x32xf32, #tpu.memory_space<vmem>>, vector<1x32xf32>
    %cst_49 = arith.constant dense<0.000000e+00> : vector<8xf32>
    %84 = vector.multi_reduction <add>, %81, %cst_49 [1] : vector<8x32xf32> to vector<8xf32>
    %85 = vector.shape_cast %84 : vector<8xf32> to vector<8x1xf32>
    %cst_50 = arith.constant 3.200000e+01 : f32
    %86 = vector.broadcast %cst_50 : f32 to vector<8x1xf32>
    %87 = arith.divf %85, %86 : vector<8x1xf32>
    %88 = vector.broadcast %87 : vector<8x1xf32> to vector<8x32xf32>
    %89 = arith.subf %81, %88 : vector<8x32xf32>
    %90 = arith.mulf %89, %89 : vector<8x32xf32>
    %cst_51 = arith.constant dense<0.000000e+00> : vector<8xf32>
    %91 = vector.multi_reduction <add>, %90, %cst_51 [1] : vector<8x32xf32> to vector<8xf32>
    %92 = vector.shape_cast %91 : vector<8xf32> to vector<8x1xf32>
    %cst_52 = arith.constant 3.200000e+01 : f32
    %93 = vector.broadcast %cst_52 : f32 to vector<8x1xf32>
    %94 = arith.divf %92, %93 : vector<8x1xf32>
    %95 = vector.broadcast %87 : vector<8x1xf32> to vector<8x32xf32>
    %96 = arith.subf %81, %95 : vector<8x32xf32>
    %cst_53 = arith.constant 9.99999974E-6 : f32
    %97 = vector.broadcast %cst_53 : f32 to vector<8x1xf32>
    %98 = arith.addf %94, %97 : vector<8x1xf32>
    %99 = math.rsqrt %98 : vector<8x1xf32>
    %100 = vector.broadcast %99 : vector<8x1xf32> to vector<8x32xf32>
    %101 = arith.mulf %96, %100 : vector<8x32xf32>
    %102 = vector.broadcast %82 : vector<1x32xf32> to vector<8x32xf32>
    %103 = arith.mulf %101, %102 : vector<8x32xf32>
    %104 = vector.broadcast %83 : vector<1x32xf32> to vector<8x32xf32>
    %105 = arith.addf %103, %104 : vector<8x32xf32>
    %106 = vector.shape_cast %105 : vector<8x32xf32> to vector<1x8x32xf32>
    %c0_54 = arith.constant 0 : index
    %c0_55 = arith.constant 0 : index
    %c0_56 = arith.constant 0 : index
    %107 = vector.load %arg3[%c0_54, %c0_55, %c0_56] : memref<1x8x1xf32, #tpu.memory_space<vmem>>, vector<1x8x1xf32>
    %108 = vector.broadcast %107 : vector<1x8x1xf32> to vector<1x8x32xf32>
    %109 = arith.mulf %106, %108 : vector<1x8x32xf32>
    %c0_57 = arith.constant 0 : index
    %c0_58 = arith.constant 0 : index
    %c0_59 = arith.constant 0 : index
    %110 = vector.load %arg18[%c0_57, %c0_58, %c0_59] : memref<1x8x32xf32, #tpu.memory_space<vmem>>, vector<1x8x32xf32>
    tpu.vector_store %arg18[%c0_57, %c0_58, %c0_59], %109 {strides = array<i32>} : memref<1x8x32xf32, #tpu.memory_space<vmem>>, vector<1x8x32xf32>,
    return
  }
  func.func @transform_0(%arg0: i32) -> (i32, i32, i32) {
    %c0_i32 = arith.constant 0 : i32
    %c0_i32_0 = arith.constant 0 : i32
    %c0_i32_1 = arith.constant 0 : i32
    return %arg0, %c0_i32, %c0_i32_0 : i32, i32, i32
  }
  func.func @transform_1(%arg0: i32) -> (i32, i32, i32) {
    %c0_i32 = arith.constant 0 : i32
    %c0_i32_0 = arith.constant 0 : i32
    %c0_i32_1 = arith.constant 0 : i32
    return %arg0, %c0_i32, %c0_i32_0 : i32, i32, i32
  }
  func.func @transform_2(%arg0: i32) -> (i32, i32, i32) {
    %c0_i32 = arith.constant 0 : i32
    %c0_i32_0 = arith.constant 0 : i32
    %c0_i32_1 = arith.constant 0 : i32
    return %arg0, %c0_i32, %c0_i32_0 : i32, i32, i32
  }
  func.func @transform_3(%arg0: i32) -> (i32, i32) {
    %c0_i32 = arith.constant 0 : i32
    %c0_i32_0 = arith.constant 0 : i32
    %c0_i32_1 = arith.constant 0 : i32
    return %c0_i32, %c0_i32_0 : i32, i32
  }
  func.func @transform_4(%arg0: i32) -> (i32, i32) {
    %c0_i32 = arith.constant 0 : i32
    %c0_i32_0 = arith.constant 0 : i32
    %c0_i32_1 = arith.constant 0 : i32
    return %c0_i32, %c0_i32_0 : i32, i32
  }
  func.func @transform_5(%arg0: i32) -> (i32, i32) {
    %c0_i32 = arith.constant 0 : i32
    %c0_i32_0 = arith.constant 0 : i32
    %c0_i32_1 = arith.constant 0 : i32
    return %c0_i32, %c0_i32_0 : i32, i32
  }
  func.func @transform_6(%arg0: i32) -> (i32, i32) {
    %c0_i32 = arith.constant 0 : i32
    %c0_i32_0 = arith.constant 0 : i32
    %c0_i32_1 = arith.constant 0 : i32
    return %c0_i32, %c0_i32_0 : i32, i32
  }
  func.func @transform_7(%arg0: i32) -> (i32, i32) {
    %c0_i32 = arith.constant 0 : i32
    %c0_i32_0 = arith.constant 0 : i32
    %c0_i32_1 = arith.constant 0 : i32
    return %c0_i32, %c0_i32_0 : i32, i32
  }
  func.func @transform_8(%arg0: i32) -> (i32, i32) {
    %c0_i32 = arith.constant 0 : i32
    %c0_i32_0 = arith.constant 0 : i32
    %c0_i32_1 = arith.constant 0 : i32
    return %c0_i32, %c0_i32_0 : i32, i32
  }
  func.func @transform_9(%arg0: i32) -> (i32, i32) {
    %c0_i32 = arith.constant 0 : i32
    %c0_i32_0 = arith.constant 0 : i32
    %c0_i32_1 = arith.constant 0 : i32
    return %c0_i32, %c0_i32_0 : i32, i32
  }
  func.func @transform_10(%arg0: i32) -> (i32, i32) {
    %c0_i32 = arith.constant 0 : i32
    %c0_i32_0 = arith.constant 0 : i32
    %c0_i32_1 = arith.constant 0 : i32
    return %c0_i32, %c0_i32_0 : i32, i32
  }
  func.func @transform_11(%arg0: i32) -> (i32, i32) {
    %c0_i32 = arith.constant 0 : i32
    %c0_i32_0 = arith.constant 0 : i32
    %c0_i32_1 = arith.constant 0 : i32
    return %c0_i32, %c0_i32_0 : i32, i32
  }
  func.func @transform_12(%arg0: i32) -> (i32, i32) {
    %c0_i32 = arith.constant 0 : i32
    %c0_i32_0 = arith.constant 0 : i32
    %c0_i32_1 = arith.constant 0 : i32
    return %c0_i32, %c0_i32_0 : i32, i32
  }
  func.func @transform_13(%arg0: i32) -> (i32, i32) {
    %c0_i32 = arith.constant 0 : i32
    %c0_i32_0 = arith.constant 0 : i32
    %c0_i32_1 = arith.constant 0 : i32
    return %c0_i32, %c0_i32_0 : i32, i32
  }
  func.func @transform_14(%arg0: i32) -> (i32, i32) {
    %c0_i32 = arith.constant 0 : i32
    %c0_i32_0 = arith.constant 0 : i32
    %c0_i32_1 = arith.constant 0 : i32
    return %c0_i32, %c0_i32_0 : i32, i32
  }
  func.func @transform_15(%arg0: i32) -> (i32, i32) {
    %c0_i32 = arith.constant 0 : i32
    %c0_i32_0 = arith.constant 0 : i32
    %c0_i32_1 = arith.constant 0 : i32
    return %c0_i32, %c0_i32_0 : i32, i32
  }
  func.func @transform_16(%arg0: i32) -> (i32, i32) {
    %c0_i32 = arith.constant 0 : i32
    %c0_i32_0 = arith.constant 0 : i32
    %c0_i32_1 = arith.constant 0 : i32
    return %c0_i32, %c0_i32_0 : i32, i32
  }
  func.func @transform_17(%arg0: i32) -> (i32, i32, i32) {
    %c0_i32 = arith.constant 0 : i32
    %c0_i32_0 = arith.constant 0 : i32
    %c0_i32_1 = arith.constant 0 : i32
    return %arg0, %c0_i32, %c0_i32_0 : i32, i32, i32
  }
}

</mosaic_0001>

<bundles_post_ra>
// kernel: tpu_custom_call.1
= control target key start
LH: loop header
LB: loop body
LE: loop exit
PB: predicated region body
PF: predicated region fallthrough
CT: control target
= control target key end

     0   :  { %s2214_s0 = inlined_call_operand.vmem [shape: f32[2,16,32], index: 0, kind: input, shape index: {}]   ;;  %s2215_s1 = inlined_call_operand.vmem [shape: f32[2,1,16], index: 1, kind: input, shape index: {}]   ;;  %s2216_s2 = inlined_call_operand.vmem [shape: f32[2,8,1], index: 2, kind: input, shape index: {}]   ;;  %s2217_s3 = inlined_call_operand.vmem [shape: f32[32,32], index: 3, kind: input, shape index: {}]   ;;  %s2218_s4 = inlined_call_operand.vmem [shape: f32[1,32], index: 4, kind: input, shape index: {}]   ;;  %s2219_s5 = inlined_call_operand.vmem [shape: f32[32,64], index: 5, kind: input, shape index: {}]   ;;  %s2220_s6 = inlined_call_operand.vmem [shape: f32[1,64], index: 6, kind: input, shape index: {}]   ;;  %s2221_s7 = inlined_call_operand.hbm [shape: f32[32,32], index: 7, kind: input, shape index: {}]   ;;  %s2222_s8 = inlined_call_operand.vmem [shape: f32[1,32], index: 8, kind: input, shape index: {}]   ;;  %s2223_s9 = inlined_call_operand.vmem [shape: f32[1,32], index: 9, kind: input, shape index: {}]   ;;  %s2224_s10 = inlined_call_operand.vmem [shape: f32[1,32], index: 10, kind: input, shape index: {}]   ;;  %s2225_s11 = inlined_call_operand.hbm [shape: f32[32,64], index: 11, kind: input, shape index: {}]   ;;  %s2226_s12 = inlined_call_operand.vmem [shape: f32[1,64], index: 12, kind: input, shape index: {}]   ;;  %s2227_s13 = inlined_call_operand.vmem [shape: f32[64,32], index: 13, kind: input, shape index: {}]   ;;  %s2228_s14 = inlined_call_operand.vmem [shape: f32[1,32], index: 14, kind: input, shape index: {}]   ;;  %s2229_s15 = inlined_call_operand.vmem [shape: f32[1,32], index: 15, kind: input, shape index: {}]   ;;  %s2230_s16 = inlined_call_operand.vmem [shape: f32[1,32], index: 16, kind: input, shape index: {}]   ;;  %s2231_s17 = inlined_call_operand.hbm [shape: f32[2,8,32], index: 17, kind: output, shape index: {}]  }
   0x1   :  { %2244 = sst [smem:[#allocation18_spill]] %s2214_s0 }
   0x2   :  { %2245 = sst [smem:[#allocation19_spill]] %s2215_s1 }
   0x3   :  { %2246 = sst [smem:[#allocation20_spill]] %s2230_s16 }
   0x4   :  { %2247 = sst [smem:[#allocation21_spill]] %s2231_s17 }
   0x5   :  { %22 = vsyncpa [#allocation3], 0 }
   0x6   :  { %23 = vsyncpa [#allocation6], 0 }
   0x7   :  { %24 = vsyncpa [#allocation4], 0 }
   0x8   :  { %26 = vsyncpa [#allocation4 + $0x1], 0  ;;  %s1911_s24 = smov 0   ;;  %s1913_s25 = smov 0  }
   0x9   :  { %s1915_s26 = smov 0   ;;  %s1917_s27 = smov 0  }
   0xa LB: > { %2248 = sst [smem:[#allocation11_spill]] %s1797_s24  ;;  %s1932_s28 = sadd.s32 4294967295, %s1809_s27   ;;  %s1809_s27 = sphi %s1917_s27, %s2274_s27   ;;  %s1805_s26 = sphi %s1915_s26, %s2276_s26   ;;  %s1801_s25 = sphi %s1913_s25, %s2278_s25   ;;  %s1797_s24 = sphi %s1911_s24, %s2277_s24  }
   0xb   : > { %2249 = sst [smem:[#allocation12_spill]] %s1805_s26  ;;  %s1407_s29 = sadd.s32 4294967294, %s1809_s27  }
   0xc   : > { %2250 = sst [smem:[#allocation13_spill]] %s1809_s27  ;;  %s1936_s0 = sadd.s32 1, %s1809_s27  }
   0xd   : > { %2251 = sst [smem:[#allocation14_spill]] %s1936_s0  ;;  %s411_s30 = sadd.s32 1, %s1805_s26 }
   0xe   : > { %s408_s18 = ssub.s32 %s1809_s27, %s1936_s0  ;;  %p421_p0 = scmp.ne.s32.totalorder %s1805_s26, %s1801_s25 }
   0xf   : > { %p409_p1 = scmp.eq.s32.totalorder %s408_s18, 0  ;;  %p422_p2 = scmp.eq.s32.totalorder %s1932_s28, 1 }
  0x10   : > { %p427_p3 = scmp.ne.s32.totalorder %s1801_s25, %s1797_s24  ;;  %p428_p4 = scmp.eq.s32.totalorder %s1407_s29, 1 }
  0x11   : > { %s1947_s19 = scalar_select %p409_p1, %s1805_s26, %s411_s30  }
  0x12   : > { %p1949_p5 = por %p422_p2, %p421_p0  ;;  %p1953_p6 = por %p428_p4, %p427_p3 }
  0x13   : > { %2252 = sst [smem:[#allocation15_spill]] %s1947_s19  ;;  %p1408_p7 = scmp.ge.s32.totalorder %s1809_s27, 1 }
  0x14   : > { %s2253_s1 = scalar_select %p1949_p5, 1, 0 }
  0x15   : > { %s2255_s20 = scalar_select %p1953_p6, 1, 0 }
  0x16   : > { %2254 = sst [smem:[#allocation16_spill]] %s2253_s1  ;;  %p435_p8 = scmp.lt.s32.totalorder %s1809_s27, 3 }
  0x17   : > { %2256 = sst [smem:[#allocation17_spill]] %s2255_s20  ;;  %p2238_p9 = scmp.eq.s32.totalorder %s1932_s28, 0 }
  0x18   : > { %p1960_p10 = pnand %p1408_p7, %p435_p8  ;;  %s1811_s22 = smov [#allocation2]  }
  0x19   : > { %s459_s23 = sshll.u32 %s1811_s22, 4  ;;  %s1812_s30 = smov [#allocation5]   ;;  %s460_s23 = int_to_ptr.vmem [resolvable:$true] %s459_s23 }
  0x1a   : > { %s2257_s21 = scalar_select %p1960_p10, 1, 0 }
  0x1b   : > { %p1612_p11 = pneg %p1960_p10  ;;  %s481_s18 = sshll.u32 %s1812_s30, 4  ;;  %s1972_s18 = int_to_ptr.vmem [resolvable:$true] %s481_s18 }
  0x1c   : > { %s1683_s0 = scalar_lea.hbm %s2221_s7, 512 }
  0x1d   : > { %p1968_p12 = pnand %p2238_p9, %p1612_p11  ;;  %p1684_p13 = scmp.ne.s32.totalorder %s2221_s7, %s1683_s0 }
  0x1e   : > { %p1690_p3 = scmp.lt.u32.totalorder %s1683_s0, %s2221_s7 }
  0x1f   : > { %p1685_p0 = pneg %p1968_p12 }
  0x21   : > { %p1686_p1 = pnand %p1685_p0, %p1684_p13 }
  0x23   : > { %p1687_p2 = pneg %p1686_p1 }
  0x25   : > { %p1692_p4 = pnand %p1690_p3, %p1687_p2 }
  0x27   : > { %1695 = shalt.err (!%p1692_p4)
}
  0x28   : > { %s1696_s30 = scalar_lea.vmem %s460_s23, 512  ;;  %p1704_p9 = scmp.lt.s32.totalorder %s460_s23, %s460_s23 }
  0x29   : > { %p1697_p7 = scmp.ne.s32.totalorder %s460_s23, %s1696_s30  ;;  %p1705_p6 = scmp.lt.s32.totalorder %s1696_s30, %s1696_s30 }
  0x2b   : > { %p1699_p8 = pnand %p1697_p7, %p1685_p0  ;;  %p1706_p5 = por %p1705_p6, %p1704_p9 }
  0x2d   : > { %p1700_p11 = pneg %p1699_p8 }
  0x2f   : > { %p1707_p10 = pnand %p1706_p5, %p1700_p11 }
  0x31   : > { %1710 = shalt.err (!%p1707_p10)
}
  0x32   : > { %s1813_s26 = smov 128   ;;  %s1814_s19 = smov 8  }
  0x33   : > { %1615 = dma.hbm_to_vmem [thread:$0]  (!%p1968_p12), %s2221_s7, 512, %s460_s23, [#allocation3], %s1813_s26, %s1813_s26, %s1814_s19  }
  0x34   : > { %s1711_s22 = scalar_lea.hbm %s2225_s11, 512 }
  0x35   : > { %p1712_p13 = scmp.ne.s32.totalorder %s2225_s11, %s1711_s22  ;;  %p1718_p9 = scmp.lt.u32.totalorder %s1711_s22, %s2225_s11 }
  0x37   : > { %p1714_p5 = pnand %p1712_p13, %p1685_p0 }
  0x39   : > { %p1715_p6 = pneg %p1714_p5 }
  0x3b   : > { %p1720_p10 = pnand %p1718_p9, %p1715_p6 }
  0x3d   : > { %1723 = shalt.err (!%p1720_p10)
}
  0x3e   : > { %s1724_s23 = scalar_lea.vmem %s1972_s18, 512  ;;  %p1732_p4 = scmp.lt.s32.totalorder %s1972_s18, %s1972_s18 }
  0x3f   : > { %p1725_p1 = scmp.ne.s32.totalorder %s1972_s18, %s1724_s23  ;;  %p1733_p7 = scmp.lt.s32.totalorder %s1724_s23, %s1724_s23 }
  0x41   : > { %p1727_p2 = pnand %p1725_p1, %p1685_p0  ;;  %p1734_p8 = por %p1733_p7, %p1732_p4 }
  0x43   : > { %p1728_p3 = pneg %p1727_p2 }
  0x45   : > { %p1735_p11 = pnand %p1734_p8, %p1728_p3 }
  0x47   : > { %1738 = shalt.err (!%p1735_p11)
}
  0x48   : > { %1618 = dma.hbm_to_vmem [thread:$0]  (!%p1968_p12), %s2225_s11, 512, %s1972_s18, [#allocation6], %s1813_s26, %s1813_s26, %s1814_s19  }
  0x49   : > { %p2259_p13 = scmp.ne.s32.totalorder %s2257_s21, 0 }
  0x4a   : > { %p2260_p5 = scmp.eq.s32.totalorder (!%p2259_p13), %s1932_s28, 0 }
  0x4b   : > { %533 = sbr.rel (%p2259_p13) target bundleno = 2355 (0x933), region = 88 }
  0x52   : > { %1784 = dma.done.wait (%p2260_p5), [#allocation3], 512   ;;  %p2261_p0 = pmov %p2260_p5 }
  0x54   : > { %1786 = vsyncadd (%p2261_p0), [#allocation3], 4294966784  ;;  %p2262_p6 = pmov %p2261_p0 }
  0x55   : > { %p2263_p9 = pmov %p2261_p0 }
  0x56   : > { %1788 = dma.done.wait (%p2262_p6), [#allocation6], 512  }
  0x57   : > { %1790 = vsyncadd (%p2263_p9), [#allocation6], 4294966784  ;;  %p596_p10 = scmp.lt.s32.totalorder %s1932_s28, 1  ;;  %v1815_v0 = vmov 0.0|0.0   ;;  %vm1816_vm0 = vmmov 0   ;;  %v1817_v1 = vmov 0.0  }
  0x58   : > { %1575 = vmatprep.subr.bf16.mxu1 %v1815_v0  ;;  %1513 = vmatprep.mubr.msk.f32.mxu1 %vm1816_vm0, %v1817_v1  ;;  %s2264_s26 = sld [smem:[#allocation18_spill]]  ;;  %vm621_vm1 = vcmask 261120   ;;  %v610_v2 = vld [vmem:[%s2219_s5] sm:$0xff]  ;;  %v611_v3 = vld [vmem:[%s2219_s5 + $0x8] sm:$0xff]  ;;  %v612_v4 = vld [vmem:[%s2219_s5 + $0x10] sm:$0xff]  ;;  %s1818_s22 = smov 96  }
  0x59   : > { %s2034_s1 = scalar_select %p596_p10, %s1932_s28, 1  ;;  %v1557_v5 = vpack.c.bf16 %v611_v3, %v610_v2  ;;  %v613_v6 = vld [vmem:[%s2219_s5 + $0x18] sm:$0xff]  ;;  %v703_v9 = vld [vmem:[%s2217_s3] sm:$0xff]  ;;  %v704_v10 = vld [vmem:[%s2217_s3 + $0x8] sm:$0xff]  ;;  %vm872_vm3 = vcmask 130048   ;;  %vm1179_vm4 = vcmask 523264  }
  0x5a   : > { %v1561_v8 = vpack.c.bf16 %v613_v6, %v612_v4  ;;  %v1566_v12 = vpack.c.bf16 %v704_v10, %v703_v9  ;;  %v705_v13 = vld [vmem:[%s2217_s3 + $0x10] sm:$0xff]  ;;  %v706_v14 = vld [vmem:[%s2217_s3 + $0x18] sm:$0xff]  ;;  %v1419_v16 = vld [vmem:[%s2220_s6] ss:$0 sm:$0xff]  ;;  %s593_s24 = sand.u32 1, %s1801_s25   ;;  %s2266_s20 = sld [smem:[#allocation16_spill]] }
  0x5b   : > { %s1443_s21 = sshll.u32 %s2034_s1, 4  ;;  %1558 = vmatprep.subr.bf16.mxu0 %v1557_v5  ;;  %v1569_v15 = vpack.c.bf16 %v706_v14, %v705_v13  ;;  %vm1573_vm2 = vmpackc.low %vm621_vm1, %vm621_vm1  ;;  %v1422_v23 = vld [vmem:[%s2218_s4] ss:$0 sm:$0xff]  ;;  %v964_v44 = vld [vmem:[#allocation2 + $0x8] sm:$0xff]  ;;  %s1415_s27 = sshll.u32 %s593_s24, 3 }
  0x5c   : > { %1560 = vmatpush3.bf16.msra.mxu0 %v1557_v5  ;;  %v963_v43 = vld [vmem:[#allocation2] sm:$0xff]  ;;  %v965_v48 = vld [vmem:[#allocation2 + $0x10] sm:$0xff]  ;;  %v966_v49 = vld [vmem:[#allocation2 + $0x18] sm:$0xff]  ;;  %s2267_s30 = sld [smem:[#allocation20_spill]]  ;;  %s1440_s23 = sshll.u32 %s1932_s28, 7 }
  0x5d   : > { %1562 = vmatprep.subr.bf16.mxu0 %v1561_v8  ;;  %v1579_v46 = vpack.c.bf16 %v964_v44, %v963_v43  ;;  %v1582_v50 = vpack.c.bf16 %v966_v49, %v965_v48  ;;  %v1430_v54 = vld [vmem:[%s2222_s8] ss:$0 sm:$0xff]  ;;  %v1080_v2 = vld [vmem:[#allocation5 + $0x8] sm:$0xff]  ;;  %v1081_v4 = vld [vmem:[#allocation5 + $0x10] sm:$0xff]  ;;  %s595_s16 = scalar_lea.vmem [#allocation7], %s1415_s27  ;;  %s2268_s18 = sld [smem:[#allocation21_spill]] }
  0x5e   : > { %s600_s19 = scalar_lea.vmem %s2264_s26, %s1443_s21  ;;  %s2265_s21 = sld [smem:[#allocation19_spill]]  ;;  %v1082_v5 = vld [vmem:[#allocation5 + $0x18] sm:$0xff]  ;;  %v1166_v9 = vld [vmem:[%s2227_s13 + $0x10] sm:$0xff]  ;;  %v1168_v13 = vld [vmem:[%s2227_s13 + $0x20] sm:$0xff] }
  0x5f   : > { %v608_v7 = vld [vmem:[%s600_s19] sm:$0xff]  ;;  %v2061_v11 = vld [vmem:[%s600_s19 + $0x8] sm:$0xff]  ;;  %v1588_v6 = vpack.c.bf16 %v1082_v5, %v1081_v4  ;;  %s1305_s17 = sshll.u32 %s595_s16, 4  ;;  %s1292_s0 = scalar_lea.sflag [#allocation4], %s593_s24  ;;  %s2173_s17 = int_to_ptr.vmem [resolvable:$true] %s1305_s17 }
  0x60   : > { %1488 = vmatprep.mubr.msk.f32.mxu0 %vm621_vm1, %v608_v7  ;;  %1564 = vmatpush3.bf16.msra.mxu0 %v1561_v8  ;;  %v1164_v7 = vld [vmem:[%s2227_s13] sm:$0xff]  ;;  %v1165_v8 = vld [vmem:[%s2227_s13 + $0x8] sm:$0xff]  ;;  %s1739_s19 = scalar_lea.vmem %s2173_s17, 128  ;;  %p2269_p1 = scmp.ne.s32.totalorder %s2266_s20, 0 }
  0x61   : > { %1565 = vmatprep.subr.bf16.mxu0 %v1815_v0  ;;  %v1591_v10 = vpack.c.bf16 %v1165_v8, %v1164_v7  ;;  %v1169_v14 = vld [vmem:[%s2227_s13 + $0x28] sm:$0xff]  ;;  %v1437_v49 = vld [vmem:[%s2229_s15] ss:$0 sm:$0xff]  ;;  %p1740_p12 = scmp.ne.s32.totalorder %s2173_s17, %s1739_s19  ;;  %s1820_s28 = smov [#allocation7]  }
  0x62   : > { %s1743_s27 = sshll.u32 %s1820_s28, 4  ;;  %s1744_s27 = int_to_ptr.vmem [resolvable:$false] %s1743_s27 }
  0x63   : > { %1489 = vmatmul.mubr.msk.f32.vlgmr.msra.gmra.mrb[0].mxu0 %vm621_vm1, %v2061_v11  ;;  %p1741_p2 = pnand %p1740_p12, %p2269_p1  ;;  %p1746_p4 = scmp.lt.s32.totalorder %s2173_s17, %s1744_s27 }
  0x64   : > { %1567 = vmatpush3.bf16.msra.mxu0 %v1566_v12  ;;  %1499 = vmatprep.mubr.msk.f32.mxu0 %vm1816_vm0, %v1817_v1  ;;  %s603_s29 = scalar_lea.vmem %s2265_s21, %s2034_s1  ;;  %s1418_s21 = sshll.u32 %s2034_s1, 3 }
  0x65   : > { %1568 = vmatprep.subr.bf16.mxu0 %v1815_v0  ;;  %v1427_v32 = vld [vmem:[%s603_s29] ss:$0 sm:$0xff]  ;;  %s607_s26 = scalar_lea.vmem %s2216_s2, %s1418_s21  ;;  %p1742_p3 = pneg %p1741_p2 }
  0x66   : > { %v1283_v44 = vld [vmem:[%s607_s26] sm:$0xff]  ;;  %s2171_s26 = scalar_lea.hbm %s2268_s18, %s1440_s23  ;;  %s1745_s1 = scalar_lea.vmem %s1744_s27, 256 }
  0x67   : > { %p1747_p7 = scmp.lt.s32.totalorder %s1745_s1, %s1739_s19 }
  0x68   : > { %1570 = vmatpush3.bf16.msra.mxu0 %v1569_v15  ;;  %v1597_v15 = vpack.c.bf16 %v1169_v14, %v1168_v13 }
  0x69   : > { %1571 = vmatprep.subr.bf16.mxu0 %v1815_v0  ;;  %p1748_p8 = por %p1747_p7, %p1746_p4 }
  0x6b   : > { %1500 = vmatmul.mubr.msk.f32.vlgmr.msra.gmra.mrb[2].mxu0 %vm621_vm1, %v2061_v11  ;;  %p1749_p11 = pnand %p1748_p8, %p1742_p3 }
  0x6c   : > { %1506 = vmatprep.mubr.msk.f32.mxu0 %vm1816_vm0, %v1817_v1 }
 0x136   : > { %v1490_v17 = vpop.f32.mrb[0].mxu0 }
 0x137   : > { %v700_v18 = vadd.f32 %v1490_v17, %v1419_v16  ;;  %v694_v19 = vpop.f32.mrb[1].mxu0 }
 0x138   : > { %v695_v20 = vadd.f32 %v1419_v16, %v694_v19 }
 0x13a   : > { %v1572_v21 = vpack.c.bf16 %v700_v18, %v695_v20  ;;  %v1669_v22 = vpack.i.bf16 %v700_v18, %v695_v20  ;;  %v1431_v20 = vld [vmem:[%s2223_s9] ss:$0 sm:$0xff] }
 0x13c   : > { %1670 = vrot.lane.b32.xlu1 %v1669_v22, %s1818_s22  ;;  %1574 = vmatpush3.bf16.xpose.msk.msra.mxu0 %vm1573_vm2, %v1572_v21  ;;  %v1432_v22 = vld [vmem:[%s2224_s10] ss:$0 sm:$0xff] }
 0x13d   : > { %1584 = vmatprep.subr.bf16.mxu0 %v1815_v0 }
 0x13e   : > { %v780_v24 = vpop.f32.mrb[2].mxu0 }
 0x13f   : > { %v781_v25 = vadd.f32 %v1422_v23, %v780_v24  ;;  %v1501_v26 = vpop.f32.mrb[3].mxu0 }
 0x143   : > { %1507 = vmatmul.mubr.msk.f32.vlgmr.msra.gmra.mrb[4].mxu0 %vm621_vm1, %v781_v25  ;;  %v1171_v25 = vld [vmem:[%s2227_s13 + $0x38] sm:$0xff] }
 0x144   : > { %1535 = vmatprep.mubr.msk.f32.mxu0 %vm1816_vm0, %v1817_v1 }
 0x1ae   : > { %v1671_v27 = vpop.permute.xlu1 %1670 }
 0x1af   : > { %v1673_v28 = vunpack.i.h.bf16 %v1671_v27  ;;  %v1672_v29 = vunpack.i.l.bf16 %v1671_v27  ;;  %v1433_v27 = vld [vmem:[%s2226_s12] ss:$0 sm:$0xff] }
 0x1b1   : > { %v1576_v30 = vpack.c.bf16 %v1673_v28, %v1672_v29 }
 0x1b3   : > { %1577 = vmatpush3.bf16.msra.mxu1 %v1576_v30 }
 0x1b4   : > { %1578 = vmatprep.subr.bf16.mxu1 %v1815_v0 }
 0x216   : > { %v859_v31 = vpop.f32.mrb[4].mxu0 }
 0x217   : > { %v863_v33 = vmul.f32 0.17677669, %v859_v31  ;;  %v1508_v34 = vpop.f32.mrb[5].mxu0 }
 0x219   : > { %v871_v35 = vadd.f32 %v1427_v32, %v863_v33  ;;  %v1435_v32 = vld [vmem:[%s2228_s14] ss:$0 sm:$0xff] }
 0x21b   : > { %v873_v36 = vsel %vm872_vm3, %v871_v35, -inf }
 0x21c   : > { %874 = vmax.xlane.f32.xlu0 %v873_v36 }
 0x2a9   : > { %v875_v37 = vpop.xlane.xlu0 %874 }
 0x2aa   : > { %v876_v38 = vsub.f32 %v871_v35, %v875_v37 }
 0x2ac   : > { %v877_v39 = vmul.f32 1.442695, %v876_v38  ;;  %v1819_v38 = vmov 0  }
 0x2ad   : > { %1674 = vset.pattern.permute.xlu0 %v1819_v38 }
 0x2ae   : > { %1675 = vpow2.f32 %v877_v39 }
 0x2b8   : > { %v1676_v40 = vpop.eup %1675 }
 0x2b9   : > { %v879_v41 = vsel %vm872_vm3, %v1676_v40, 0.0 }
 0x2ba   : > { %880 = vadd.xlane.f32.xlu0 %v879_v41 }
 0x347   : > { %v881_v42 = vpop.xlane.xlu0 %880 }
 0x348   : > { %1677 = vrcp.f32 %v881_v42 }
 0x352   : > { %v1678_v45 = vpop.eup %1677 }
 0x353   : > { %v883_v47 = vmul.f32 %v1678_v45, %v1676_v40 }
 0x355   : > { %1514 = vmatmul.mubr.msk.f32.vlgmr.msra.gmra.mrb[0].mxu1 %vm872_vm3, %v883_v47 }
 0x356   : > { %1580 = vmatpush3.bf16.msra.mxu1 %v1579_v46  ;;  %1524 = vmatprep.mubr.msk.f32.mxu1 %vm1816_vm0, %v1817_v1 }
 0x357   : > { %1581 = vmatprep.subr.bf16.mxu1 %v1815_v0 }
 0x35a   : > { %1583 = vmatpush3.bf16.msra.mxu1 %v1582_v50 }
 0x35b   : > { %1590 = vmatprep.subr.bf16.mxu1 %v1815_v0 }
 0x428   : > { %v959_v51 = vpop.f32.mrb[0].mxu1 }
 0x429   : > { %v1515_v52 = vpop.f32.mrb[1].mxu1  ;;  %1525 = vmatmul.mubr.msk.f32.vlgmr.msra.gmra.mrb[2].mxu1 %vm621_vm1, %v959_v51  ;;  %v1438_v51 = vld [vmem:[%s2267_s30] ss:$0 sm:$0xff] }
 0x42a   : > { %1554 = vmatprep.mubr.msk.f32.mxu1 %vm1816_vm0, %v1817_v1  ;;  %v1079_v1 = vld [vmem:[#allocation5] sm:$0xff]  ;;  %1592 = vmatpush3.bf16.msra.mxu1 %v1591_v10 }
 0x42b   : > { %v1585_v3 = vpack.c.bf16 %v1080_v2, %v1079_v1  ;;  %1593 = vmatprep.subr.bf16.mxu1 %v1815_v0 }
 0x42d   : > { %1586 = vmatpush3.bf16.msra.mxu0 %v1585_v3 }
 0x42e   : > { %1587 = vmatprep.subr.bf16.mxu0 %v1815_v0 }
 0x431   : > { %1589 = vmatpush3.bf16.msra.mxu0 %v1588_v6 }
 0x4fc   : > { %v1036_v53 = vpop.f32.mrb[2].mxu1 }
 0x4fd   : > { %v1040_v55 = vadd.f32 %v1036_v53, %v2061_v11  ;;  %v1526_v56 = vpop.f32.mrb[3].mxu1  ;;  %v1167_v11 = vld [vmem:[%s2227_s13 + $0x18] sm:$0xff] }
 0x4fe   : > { %v1594_v12 = vpack.c.bf16 %v1167_v11, %v1166_v9 }
 0x4ff   : > { %v1048_v57 = vadd.f32 %v1430_v54, %v1040_v55 }
 0x500   : > { %1595 = vmatpush3.bf16.msra.mxu1 %v1594_v12 }
 0x501   : > { %v1051_v58 = vsel %vm621_vm1, %v1048_v57, 0.0  ;;  %1596 = vmatprep.subr.bf16.mxu1 %v1815_v0 }
 0x502   : > { %1052 = vadd.xlane.f32.xlu1 %v1051_v58 }
 0x504   : > { %1598 = vmatpush3.bf16.msra.mxu1 %v1597_v15 }
 0x505   : > { %1599 = vmatprep.subr.bf16.mxu1 %v1815_v0  ;;  %v1170_v0 = vld [vmem:[%s2227_s13 + $0x30] sm:$0xff] }
 0x506   : > { %v1600_v26 = vpack.c.bf16 %v1171_v25, %v1170_v0 }
 0x508   : > { %1601 = vmatpush3.bf16.msra.mxu1 %v1600_v26 }
 0x58f   : > { %v1053_v59 = vpop.xlane.xlu1 %1052 }
 0x590   : > { %v1055_v60 = vmul.f32 0.03125, %v1053_v59 }
 0x592   : > { %v1056_v61 = vsub.f32 %v1048_v57, %v1055_v60 }
 0x594   : > { %v1057_v62 = vmul.f32 %v1056_v61, %v1056_v61 }
 0x596   : > { %v1058_v63 = vsel %vm621_vm1, %v1057_v62, 0.0 }
 0x597   : > { %1059 = vadd.xlane.f32.xlu0 %v1058_v63 }
 0x624   : > { %v1060_v16 = vpop.xlane.xlu0 %1059 }
 0x625   : > { %v1061_v17 = vmul.f32 0.03125, %v1060_v16 }
 0x627   : > { %v1062_v18 = vadd.f32 1e-05, %v1061_v17 }
 0x629   : > { %1679 = vrsqrt.f32 %v1062_v18 }
 0x633   : > { %v1680_v19 = vpop.eup %1679 }
 0x634   : > { %v1064_v21 = vmul.f32 %v1680_v19, %v1056_v61 }
 0x636   : > { %v1071_v23 = vmul.f32 %v1431_v20, %v1064_v21 }
 0x638   : > { %v1078_v24 = vadd.f32 %v1432_v22, %v1071_v23 }
 0x63a   : > { %1536 = vmatmul.mubr.msk.f32.vlgmr.msra.gmra.mrb[6].mxu0 %vm621_vm1, %v1078_v24 }
 0x70d   : > { %v1159_v28 = vpop.f32.mrb[6].mxu0 }
 0x70e   : > { %v1160_v29 = vadd.f32 %v1433_v27, %v1159_v28  ;;  %v1537_v30 = vpop.f32.mrb[7].mxu0 }
 0x710   : > { %v1163_v31 = vmax.f32 %v1160_v29, 0.0 }
 0x712   : > { %1555 = vmatmul.mubr.msk.f32.vlgmr.msra.gmra.mrb[4].mxu1 %vm1179_vm4, %v1163_v31 }
 0x7e5   : > { %v1249_v33 = vpop.f32.mrb[4].mxu1 }
 0x7e6   : > { %v1250_v34 = vadd.f32 %v1435_v32, %v1249_v33  ;;  %v1556_v35 = vpop.f32.mrb[5].mxu1 }
 0x7e8   : > { %v1253_v36 = vadd.f32 %v1250_v34, %v1078_v24 }
 0x7ea   : > { %v1256_v37 = vsel %vm621_vm1, %v1253_v36, 0.0 }
 0x7eb   : > { %1257 = vadd.xlane.f32.xlu0 %v1256_v37 }
 0x878   : > { %v1258_v39 = vpop.xlane.xlu0 %1257 }
 0x879   : > { %v1259_v40 = vmul.f32 0.03125, %v1258_v39 }
 0x87b   : > { %v1260_v41 = vsub.f32 %v1253_v36, %v1259_v40 }
 0x87d   : > { %v1261_v42 = vmul.f32 %v1260_v41, %v1260_v41 }
 0x87f   : > { %v1262_v43 = vsel %vm621_vm1, %v1261_v42, 0.0 }
 0x880   : > { %1263 = vadd.xlane.f32.xlu0 %v1262_v43 }
 0x896   : > { %1286 = vperm.xlu0 %1674, %v1283_v44  }
 0x90d   : > { %v1264_v45 = vpop.xlane.xlu0 %1263 }
 0x90e   : > { %v1265_v46 = vmul.f32 0.03125, %v1264_v45 }
 0x910   : > { %v1266_v47 = vadd.f32 1e-05, %v1265_v46 }
 0x912   : > { %1681 = vrsqrt.f32 %v1266_v47 }
 0x915   : > { %v1287_v53 = vpop.permute.xlu0 %1286 }
 0x91c   : > { %v1682_v48 = vpop.eup %1681 }
 0x91d   : > { %v1268_v50 = vmul.f32 %v1682_v48, %v1260_v41 }
 0x91f   : > { %v1275_v52 = vmul.f32 %v1437_v49, %v1268_v50 }
 0x921   : > { %v1282_v54 = vadd.f32 %v1438_v51, %v1275_v52 }
 0x923   : > { %v1289_v55 = vmul.f32 %v1287_v53, %v1282_v54 }
 0x925   : > { %1290 = vst.msk [vmem:[%s595_s16] sm:$0xff] %vm621_vm1, %v1289_v55 }
 0x926   : > { %1752 = shalt.err (!%p1749_p11)
}
 0x927   : > { %s1753_s24 = scalar_lea.hbm %s2171_s26, 128  ;;  %s1757_s23 = scalar_lea.hbm %s2268_s18, 256 }
 0x928   : > { %p1754_p13 = scmp.ne.s32.totalorder %s2171_s26, %s1753_s24  ;;  %p1758_p6 = scmp.lt.u32.totalorder %s2171_s26, %s2268_s18 }
 0x929   : > { %p1759_p9 = scmp.lt.u32.totalorder %s1757_s23, %s1753_s24  ;;  %p1761_p12 = scmp.lt.u32.totalorder %s1753_s24, %s2171_s26 }
 0x92a   : > { %p1755_p5 = pnand %p1754_p13, %p2269_p1 }
 0x92b   : > { %p1760_p10 = por %p1759_p9, %p1758_p6 }
 0x92c   : > { %p1756_p0 = pneg %p1755_p5 }
 0x92d   : > { %p1762_p2 = por %p1761_p12, %p1760_p10 }
 0x92f   : > { %p1763_p3 = pnand %p1762_p2, %p1756_p0 }
 0x931   : > { %1766 = shalt.err (!%p1763_p3)
}
 0x932   : > { %1610 = dma.vmem_to_hbm [thread:$0]  (%p2269_p1), %s2173_s17, 128, %s2171_s26, %s1292_s0  }
 0x933 PF: > { %s2270_s29 = sld [smem:[#allocation13_spill]]  ;;  %s2271_s19 = sld [smem:[#allocation11_spill]] }
 0x934   : > { %s2272_s28 = sld [smem:[#allocation17_spill]] }
 0x939   : > { %p1627_p4 = scmp.ge.s32.totalorder %s2270_s29, 2  ;;  %s1317_s27 = sand.u32 1, %s2271_s19  }
 0x93a   : > { %p2273_p7 = scmp.ne.s32.totalorder %s2272_s28, 0  ;;  %s1318_s1 = scalar_lea.sflag [#allocation4], %s1317_s27 }
 0x93c   : > { %p1620_p8 = pnand %p1627_p4, %p2273_p7 }
 0x93e   : > { %1792 = dma.done.wait (!%p1620_p8), %s1318_s1, 128  }
 0x93f   : > { %1794 = vsyncadd (!%p1620_p8), %s1318_s1, 4294967168  ;;  %s2274_s27 = sld [smem:[#allocation14_spill]]  ;;  %s2275_s22 = sld [smem:[#allocation12_spill]] }
 0x940   : > { %s2276_s26 = sld [smem:[#allocation15_spill]]  ;;  %s2277_s24 = smov %s1801_s25 }
 0x945   : > { %p29_p11 = scmp.ge.s32.totalorder %s2274_s27, 4   ;;  %s2278_s25 = smov %s2275_s22 }
 0x947   :  { %31 = sbr.rel (!%p29_p11) target bundleno = 10 (0xa), region = 138 }
 0x94e   :  { %1323 = vsyncpa [#allocation3], 1 }
 0x94f   :  { %1325 = vsyncpa [#allocation3 + $0x1], 1 }
 0x950   :  { %1326 = vsyncpa [#allocation6], 1 }
 0x951   :  { %1327 = vsyncpa [#allocation4], 1 }
 0x952   :  { %1329 = vsyncpa [#allocation4 + $0x1], 1 }

</bundles_post_ra>
